<compile_context>
chip_gen: v5e
topology: v5e:2x2
jax: 0.10.0
libtpu: 0.0.40
codegen_flags: <defaults>
</compile_context>

<pallas_src>
import functools

import jax
import jax.numpy as jnp
import numpy as np
from jax.experimental import pallas as pl
from jax.experimental.pallas import tpu as pltpu


def make_fixed_pos_embedding(embedding_dim: int,
                             max_num_embedding: int = 5000,
                             dtype=jnp.float32):
    """Replicates the PyTorch __init__: returns buffer of shape (max_N, 1, D)."""
    assert embedding_dim % 2 == 0, (
        "embedding_dim must be even (sin/cos interleave), got %d" % embedding_dim)
    position = jnp.arange(0, max_num_embedding, dtype=jnp.float32)[:, None]      # (N, 1)
    div_term = jnp.exp(
        jnp.arange(0, embedding_dim, 2, dtype=jnp.float32)
        * (-jnp.log(jnp.float32(10000.0)) / embedding_dim)
    )                                                                             # (D/2,)
    angles = position * div_term                                                  # (N, D/2)
    emb = jnp.zeros((max_num_embedding, embedding_dim), dtype=jnp.float32)
    emb = emb.at[:, 0::2].set(jnp.sin(angles))
    emb = emb.at[:, 1::2].set(jnp.cos(angles))
    # unsqueeze(0).transpose(0, 1) -> (N, 1, D)
    return emb[:, None, :].astype(dtype)


def _add_pos_kernel_2d(x_ref, emb_ref, o_ref, *, batch: int):
    # x_ref: (TS, B*D), emb_ref: (TS, D). Tile the emb row across the lane dim
    # (lane-aligned concat when D % 128 == 0) so the add + store are lane-dense.
    emb = emb_ref[...]
    if batch > 1:
        emb = jnp.tile(emb, (1, batch))          # (TS, B*D)
    o_ref[...] = (x_ref[...] + emb).astype(o_ref.dtype)


def _add_pos_kernel_3d(x_ref, emb_ref, o_ref):
    # x_ref: (TS, B, D), emb_ref: (TS, 1, D) -> broadcast add over batch dim.
    o_ref[...] = (x_ref[...] + emb_ref[...]).astype(o_ref.dtype)


def _pick_row_tile(S: int, row_bytes: int, itemsize: int, block_rows):
    """Rows per grid step: ~2 MiB x-tile, <=1024 rows, sublane-aligned."""
    sub = max(8, 8 * (4 // max(1, itemsize)))    # 8 (f32) / 16 (bf16) / 32 (int8)
    if block_rows is None:
        block_rows = min(1024, max(1, (2 << 20) // max(1, row_bytes)))
    ts = min(int(block_rows), S)
    if ts < S:
        ts = max(sub, (ts // sub) * sub)         # keep second-minor dim aligned
        ts = min(ts, S)
    return ts


def fixed_pos_embedding_forward(x, embedding, *, block_rows=None, donate_x=False):
    """x: (S, B, D); embedding: (max_N, 1, D). Returns x + embedding[:S]."""
    S, B, D = x.shape
    max_n = embedding.shape[0]
    emb = embedding.astype(x.dtype)              # store/stream emb in x's dtype
    itemsize = jnp.dtype(x.dtype).itemsize
    ts = _pick_row_tile(S, B * D * itemsize, itemsize, block_rows)
    grid = (pl.cdiv(S, ts),)
    io_alias = {0: 0} if donate_x else {}
    cparams = pltpu.CompilerParams(dimension_semantics=("parallel",))

    if D % 128 == 0:
        # Lane-dense 2-D path: fold (B, D) into the lane dimension (free reshape).
        x2 = x.reshape(S, B * D)
        emb2 = emb.reshape(max_n, D)
        out2 = pl.pallas_call(
            functools.partial(_add_pos_kernel_2d, batch=B),
            out_shape=jax.ShapeDtypeStruct((S, B * D), x.dtype),
            grid=grid,
            in_specs=[
                pl.BlockSpec((ts, B * D), lambda i: (i, 0)),   # x rows [i*ts, ...)
                pl.BlockSpec((ts, D), lambda i: (i, 0)),       # emb rows [i*ts, ...)
            ],
            out_specs=pl.BlockSpec((ts, B * D), lambda i: (i, 0)),
            input_output_aliases=io_alias,
            compiler_params=cparams,
        )(x2, emb2)
        return out2.reshape(S, B, D)

    # Fallback 3-D path for small / unaligned D: simple sublane broadcast add.
    return pl.pallas_call(
        _add_pos_kernel_3d,
        out_shape=jax.ShapeDtypeStruct((S, B, D), x.dtype),
        grid=grid,
        in_specs=[
            pl.BlockSpec((ts, B, D), lambda i: (i, 0, 0)),
            pl.BlockSpec((ts, 1, D), lambda i: (i, 0, 0)),
        ],
        out_specs=pl.BlockSpec((ts, B, D), lambda i: (i, 0, 0)),
        input_output_aliases=io_alias,
        compiler_params=cparams,
    )(x, emb)


if __name__ == "__main__":
    key = jax.random.PRNGKey(0)

    # Case 1: module-consistent toy shapes (D=32 -> 3-D broadcast fallback path).
    S, B, D = 8, 2, 32
    x = jax.random.normal(key, (S, B, D), dtype=jnp.float32)
    emb = make_fixed_pos_embedding(D, max_num_embedding=64)
    out = jax.block_until_ready(fixed_pos_embedding_forward(x, emb))
    ref = x + emb[:S]
    np.testing.assert_allclose(np.asarray(out), np.asarray(ref), rtol=1e-6, atol=1e-6)

    # Case 2: lane-dense 2-D path, several row tiles incl. a partial last tile.
    k1, k2 = jax.random.split(key)
    S2, B2, D2 = 40, 2, 128
    x2 = jax.random.normal(k1, (S2, B2, D2), dtype=jnp.float32)
    emb2 = make_fixed_pos_embedding(D2, max_num_embedding=64)
    out2 = jax.block_until_ready(
        fixed_pos_embedding_forward(x2, emb2, block_rows=16))
    ref2 = x2 + emb2[:S2]
    np.testing.assert_allclose(np.asarray(out2), np.asarray(ref2), rtol=1e-6, atol=1e-6)

    # Case 3: bf16 input -- emb streamed in bf16, explicit cast on store.
    S3, B3, D3 = 16, 2, 128
    x3 = jax.random.normal(k2, (S3, B3, D3), dtype=jnp.bfloat16)
    emb3 = make_fixed_pos_embedding(D3, max_num_embedding=32)
    out3 = jax.block_until_ready(fixed_pos_embedding_forward(x3, emb3))
    ref3 = x3 + emb3[:S3].astype(jnp.bfloat16)
    np.testing.assert_allclose(np.asarray(out3, dtype=np.float32),
                               np.asarray(ref3, dtype=np.float32),
                               rtol=1e-2, atol=1e-2)

    print("KERNEL_OK")
</pallas_src>

<mosaic_0001>
module attributes {stable_mosaic.version = 11 : i64} {
  func.func @_add_pos_kernel_3d(%arg0: i32, %arg1: memref<8x2x32xf32, #tpu.memory_space<vmem>>, %arg2: memref<8x1x32xf32, #tpu.memory_space<vmem>>, %arg3: memref<8x2x32xf32, #tpu.memory_space<vmem>>) attributes {dimension_semantics = [#tpu.dimension_semantics<parallel>], iteration_bounds = array<i64: 1>, scalar_prefetch = 0 : i64, scratch_operands = 0 : i64, tpu.core_type = #tpu.core_type<tc>, window_params = [{transform_indices = @transform_0, window_bounds = array<i64: 8, 2, 32>}, {transform_indices = @transform_1, window_bounds = array<i64: 8, 1, 32>}, {transform_indices = @transform_2, window_bounds = array<i64: 8, 2, 32>}]} {
    %c0 = arith.constant 0 : index
    %c0_0 = arith.constant 0 : index
    %c0_1 = arith.constant 0 : index
    %0 = vector.load %arg1[%c0, %c0_0, %c0_1] : memref<8x2x32xf32, #tpu.memory_space<vmem>>, vector<8x2x32xf32>
    %c0_2 = arith.constant 0 : index
    %c0_3 = arith.constant 0 : index
    %c0_4 = arith.constant 0 : index
    %1 = vector.load %arg2[%c0_2, %c0_3, %c0_4] : memref<8x1x32xf32, #tpu.memory_space<vmem>>, vector<8x1x32xf32>
    %2 = vector.broadcast %1 : vector<8x1x32xf32> to vector<8x2x32xf32>
    %3 = arith.addf %0, %2 : vector<8x2x32xf32>
    %c0_5 = arith.constant 0 : index
    %c0_6 = arith.constant 0 : index
    %c0_7 = arith.constant 0 : index
    %4 = vector.load %arg3[%c0_5, %c0_6, %c0_7] : memref<8x2x32xf32, #tpu.memory_space<vmem>>, vector<8x2x32xf32>
    tpu.vector_store %arg3[%c0_5, %c0_6, %c0_7], %3 {strides = array<i32>} : memref<8x2x32xf32, #tpu.memory_space<vmem>>, vector<8x2x32xf32>,
    return
  }
  func.func @transform_0(%arg0: i32) -> (i32, i32, i32) {
    %c0_i32 = arith.constant 0 : i32
    %c0_i32_0 = arith.constant 0 : i32
    %c0_i32_1 = arith.constant 0 : i32
    return %arg0, %c0_i32, %c0_i32_0 : i32, i32, i32
  }
  func.func @transform_1(%arg0: i32) -> (i32, i32, i32) {
    %c0_i32 = arith.constant 0 : i32
    %c0_i32_0 = arith.constant 0 : i32
    %c0_i32_1 = arith.constant 0 : i32
    return %arg0, %c0_i32, %c0_i32_0 : i32, i32, i32
  }
  func.func @transform_2(%arg0: i32) -> (i32, i32, i32) {
    %c0_i32 = arith.constant 0 : i32
    %c0_i32_0 = arith.constant 0 : i32
    %c0_i32_1 = arith.constant 0 : i32
    return %arg0, %c0_i32, %c0_i32_0 : i32, i32, i32
  }
}

</mosaic_0001>

<bundles_post_ra>
// kernel: tpu_custom_call.1
= control target key start
LH: loop header
LB: loop body
LE: loop exit
PB: predicated region body
PF: predicated region fallthrough
CT: control target
= control target key end

     0   :  { %vm60_vm0 = vcmask 254976   ;;  %s201_s0 = inlined_call_operand.vmem [shape: f32[8,2,32], index: 0, kind: input, shape index: {}]   ;;  %s202_s1 = inlined_call_operand.vmem [shape: f32[64,1,32], index: 1, kind: input, shape index: {}]   ;;  %s203_s2 = inlined_call_operand.hbm [shape: f32[8,2,32], index: 2, kind: output, shape index: {}]  }
   0x1   :  { %v12_v0 = vld [vmem:[%s201_s0] sm:$0x3]  ;;  %v13_v2 = vld [vmem:[%s201_s0 + $0x2] sm:$0x3]  ;;  %v14_v5 = vld [vmem:[%s201_s0 + $0x4] sm:$0x3] }
   0x2   :  { %v90_v1 = vld [vmem:[%s202_s1] ss:$0 sm:$0xff]  ;;  %v91_v4 = vld [vmem:[%s202_s1 + $0x1] ss:$0 sm:$0xff]  ;;  %v92_v6 = vld [vmem:[%s202_s1 + $0x2] ss:$0 sm:$0xff] }
   0x3   :  { %v52_v3 = vadd.f32 %v90_v1, %v12_v0  ;;  %v15_v7 = vld [vmem:[%s201_s0 + $0x6] sm:$0x3]  ;;  %v53_v8 = vadd.f32 %v91_v4, %v13_v2  ;;  %v93_v9 = vld [vmem:[%s202_s1 + $0x3] ss:$0 sm:$0xff]  ;;  %v16_v10 = vld [vmem:[%s201_s0 + $0x8] sm:$0x3]  ;;  %v54_v11 = vadd.f32 %v92_v6, %v14_v5 }
   0x4   :  { %v94_v12 = vld [vmem:[%s202_s1 + $0x4] ss:$0 sm:$0xff]  ;;  %v17_v13 = vld [vmem:[%s201_s0 + $0xa] sm:$0x3]  ;;  %v55_v14 = vadd.f32 %v93_v9, %v15_v7  ;;  %v95_v15 = vld [vmem:[%s202_s1 + $0x5] ss:$0 sm:$0xff] }
   0x5   :  { %61 = vst.msk [vmem:[#allocation2] sm:$0x3] %vm60_vm0, %v52_v3  ;;  %v56_v16 = vadd.f32 %v94_v12, %v16_v10  ;;  %v18_v17 = vld [vmem:[%s201_s0 + $0xc] sm:$0x3]  ;;  %v57_v18 = vadd.f32 %v95_v15, %v17_v13  ;;  %v96_v19 = vld [vmem:[%s202_s1 + $0x6] ss:$0 sm:$0xff] }
   0x6   :  { %62 = vst.msk [vmem:[#allocation2 + $0x2] sm:$0x3] %vm60_vm0, %v53_v8  ;;  %v19_v20 = vld [vmem:[%s201_s0 + $0xe] sm:$0x3]  ;;  %v97_v21 = vld [vmem:[%s202_s1 + $0x7] ss:$0 sm:$0xff]  ;;  %v58_v22 = vadd.f32 %v96_v19, %v18_v17 }
   0x7   :  { %63 = vst.msk [vmem:[#allocation2 + $0x4] sm:$0x3] %vm60_vm0, %v54_v11 }
   0x8   :  { %64 = vst.msk [vmem:[#allocation2 + $0x6] sm:$0x3] %vm60_vm0, %v55_v14 }
   0x9   :  { %65 = vst.msk [vmem:[#allocation2 + $0x8] sm:$0x3] %vm60_vm0, %v56_v16 }
   0xa   :  { %66 = vst.msk [vmem:[#allocation2 + $0xa] sm:$0x3] %vm60_vm0, %v57_v18 }
   0xb   :  { %7 = vsyncpa [#allocation3], 0  ;;  %s124_s13 = smov [#allocation2]   ;;  %s75_s17 = sshll.u32 %s203_s2, 4  ;;  %v59_v23 = vadd.f32 %v97_v21, %v19_v20  ;;  %67 = vst.msk [vmem:[#allocation2 + $0xc] sm:$0x3] %vm60_vm0, %v58_v22  ;;  %s76_s17 = int_to_ptr.hbm [resolvable:$true] %s75_s17 }
   0xc   :  { %s73_s14 = sshll.u32 %s124_s13, 4  ;;  %s125_s0 = smov 32   ;;  %s74_s14 = int_to_ptr.vmem [resolvable:$true] %s73_s14 }
   0xd   :  { %68 = vst.msk [vmem:[#allocation2 + $0xe] sm:$0x3] %vm60_vm0, %v59_v23  ;;  %s126_s18 = smov 2  }
   0xe   :  { %81 = dma.vmem_to_hbm [thread:$0]  %s74_s14, 256, %s76_s17, [#allocation3], %s125_s0, %s125_s0, %s126_s18  }
   0xf   :  { %122 = dma.done.wait [#allocation3], 256  }
  0x10   :  { %123 = vsyncadd [#allocation3], 4294967040 }
  0x11   :  { %86 = vsyncpa [#allocation3], 1 }

</bundles_post_ra>
